<compile_context>
chip_gen: v5e
topology: v5e:2x2
jax: 0.10.0
libtpu: 0.0.40
codegen_flags: <defaults>
</compile_context>

<pallas_src>
import jax
import jax.numpy as jnp
from jax.experimental import pallas as pl
from jax.experimental.pallas import tpu as pltpu

_LANE = 128


def _round_up(x, m):
    return (x + m - 1) // m * m


def _cdiv(a, b):
    return -(-a // b)


_BUFFERED = getattr(pl, "Buffered", None)


def _const_vmem_spec(shape):
    """VMEM-resident block (constant index map). Single-buffered when possible."""
    ndim = len(shape)
    idx = lambda i: (0,) * ndim
    if _BUFFERED is not None:
        try:
            return pl.BlockSpec(shape, idx, pipeline_mode=_BUFFERED(1))
        except Exception:
            pass
    return pl.BlockSpec(shape, idx)


def _make_disc_kernel(n_mm, info_pad, final_col):
    """Fused kernel: n_mm MXU Linear(+LeakyReLU) layers (seq layers + fc_info),
    then fc_final as a VPU/XLU dot product packed into column `final_col` of the
    single output tile.

    Ref order: x, (w0,b0)...(w_{n_mm-1},b_{n_mm-1}), wf_row, bf(SMEM), out
    """

    def kernel(*refs):
        x_ref = refs[0]
        p = refs[1:1 + 2 * n_mm + 2]
        out_ref = refs[-1]

        h = x_ref[...].astype(jnp.bfloat16)                    # (TB, d_in)
        for i in range(n_mm):
            w = p[2 * i][...]                                  # bf16 (in, out_pad)
            b = p[2 * i + 1][...]                              # f32  (1, out_pad)
            acc = jnp.dot(h, w, preferred_element_type=jnp.float32) + b
            if i < n_mm - 1:
                a16 = acc.astype(jnp.bfloat16)                 # bf16 epilogue
                h = jnp.maximum(a16, a16 * 0.2)
            else:
                h = jnp.maximum(acc, acc * 0.2)                # fc_info stays f32

        # seq_info (padded columns are exactly zero)
        out_ref[:, :info_pad] = h.astype(out_ref.dtype)

        # fc_final: Linear(info_dim, 1) + LeakyReLU on VPU/XLU; result packed
        # into a spare zero column of the output tile.
        wf = p[2 * n_mm][...]                                  # f32 (1, info_pad)
        bf = p[2 * n_mm + 1][0, 0]                             # f32 scalar (SMEM)
        f = jnp.sum(h * wf, axis=-1, keepdims=True) + bf       # (TB, 1) f32
        f = jnp.maximum(f, f * 0.2)
        out_ref[:, final_col:final_col + 1] = f.astype(out_ref.dtype)

    return kernel


def prepare_discriminator_params(params):
    """Pad feature dims to 128 and cast weights to bf16 ONCE (hoisted out of
    the per-call forward path). params: list of (W[in,out], b[1,out]); last
    entry is fc_final."""
    n_mm = len(params) - 1
    d_in = params[0][0].shape[0]
    info_dim = params[-2][0].shape[1]

    flat = []
    widths_pad = []
    d_prev = d_in                          # layer-0 K stays unpadded (matches raw x)
    for li in range(n_mm):
        w, b = params[li]
        fin, fout = w.shape
        fout_pad = _round_up(fout, _LANE)
        w_p = (jnp.zeros((d_prev, fout_pad), jnp.float32)
               .at[:fin, :fout].set(w).astype(jnp.bfloat16))
        b_p = jnp.zeros((1, fout_pad), jnp.float32).at[:, :fout].set(b)
        flat += [w_p, b_p]
        widths_pad.append(fout_pad)
        d_prev = fout_pad
    info_pad = d_prev

    wf, bf = params[-1]                                    # (info_dim, 1), (1, 1)
    wf_row = (jnp.zeros((1, info_pad), jnp.float32)
              .at[:, :info_dim].set(wf.reshape(1, -1)))
    bf_p = jnp.asarray(bf, jnp.float32).reshape(1, 1)
    flat += [wf_row, bf_p]

    meta = dict(n_mm=n_mm, d_in=d_in, info_dim=info_dim,
                info_pad=info_pad, widths_pad=tuple(widths_pad))
    return flat, meta


def discriminator_forward(x, prepared, *, tb=2048):
    """prepared = prepare_discriminator_params(params).
    Returns (final_out [B,1] f32, seq_info [B,info_dim] f32)."""
    flat, meta = prepared
    n_mm = meta["n_mm"]
    d_in = meta["d_in"]
    info_dim = meta["info_dim"]
    info_pad = meta["info_pad"]
    widths_pad = list(meta["widths_pad"])

    B, xd = x.shape
    assert xd == d_in, (xd, d_in)

    # fc_final packs into a spare zero column when one exists; otherwise a
    # single extra lane block is appended (rare: info_dim multiple of 128).
    if info_pad > info_dim:
        out_cols, final_col = info_pad, info_dim
    else:
        out_cols, final_col = info_pad + _LANE, info_pad

    # ---- generation-aware VMEM budget & batch-tile selection ----
    try:
        vmem_cap = int(pltpu.get_tpu_info().vmem_capacity_bytes)
    except Exception:
        vmem_cap = 128 * 2 ** 20
    vmem_budget = int(0.75 * vmem_cap)

    param_bytes = sum(int(a.size) * a.dtype.itemsize for a in flat)
    max_w = max([d_in, out_cols] + widths_pad)
    per_row = (2 * d_in * 4            # x tiles (f32, double-buffered)
               + 2 * out_cols * 4      # output tiles (f32, double-buffered)
               + 3 * max_w * 4         # live f32 activation temporaries
               + 2 * max_w * 2)        # bf16 activation copies
    avail = vmem_budget - param_bytes - (4 << 20)      # Mosaic scratch margin
    tb_cap = max(256, (avail // per_row) // 16 * 16)

    tb_eff = max(16, min(_round_up(tb, 16), tb_cap, _round_up(B, 16)))
    # balance block sizes over the batch; keep >=2 grid steps when possible
    # so both v7x TensorCores get work under dimension_semantics=("parallel",).
    nb = _cdiv(B, tb_eff)
    if B > 16:
        nb = max(nb, 2)
    tb_eff = min(_round_up(_cdiv(B, nb), 16), max(16, tb_cap))
    grid = (_cdiv(B, tb_eff),)

    # ---- specs ----
    in_specs = [pl.BlockSpec((tb_eff, d_in), lambda i: (i, 0))]
    for a in flat[:-1]:                                   # weights + biases + wf_row
        in_specs.append(_const_vmem_spec(a.shape))
    in_specs.append(pl.BlockSpec(memory_space=pltpu.MemorySpace.SMEM))  # bf scalar

    out_shape = jax.ShapeDtypeStruct((B, out_cols), jnp.float32)
    out_specs = pl.BlockSpec((tb_eff, out_cols), lambda i: (i, 0))

    # ---- cost estimate ----
    flops = 0
    d_prev = d_in
    for w_pad in widths_pad:
        flops += 2 * B * d_prev * w_pad
        d_prev = w_pad
    flops += 2 * B * info_pad                             # fc_final (VPU/XLU)
    bytes_accessed = B * d_in * 4 + param_bytes + B * out_cols * 4

    vmem_need = param_bytes + tb_eff * per_row + (8 << 20)
    vmem_limit = int(min(vmem_budget, max(32 * 2 ** 20, 2 * vmem_need)))

    kernel = _make_disc_kernel(n_mm, info_pad, final_col)
    out = pl.pallas_call(
        kernel,
        out_shape=out_shape,
        grid=grid,
        in_specs=in_specs,
        out_specs=out_specs,
        compiler_params=pltpu.CompilerParams(
            dimension_semantics=("parallel",),
            vmem_limit_bytes=vmem_limit,
        ),
        cost_estimate=pl.CostEstimate(
            flops=int(flops), transcendentals=0,
            bytes_accessed=int(bytes_accessed)),
    )(x, *flat)

    final_out = out[:, final_col:final_col + 1]
    seq_info = out[:, :info_dim]
    return final_out, seq_info


def init_discriminator_params(key, input_dim, info_dim, discriminator_dim):
    """Deterministic init mirroring torch.nn.Linear default (U[-1/sqrt(fan_in),+]).
    Returns list of (W[in,out], b[1,out]) for seq layers, fc_info, fc_final."""
    dims_in_out = []
    d = input_dim
    for item in discriminator_dim:
        dims_in_out.append((d, item))
        d = item
    dims_in_out.append((d, info_dim))   # fc_info
    dims_in_out.append((info_dim, 1))   # fc_final

    params = []
    for (fin, fout) in dims_in_out:
        key, kw, kb = jax.random.split(key, 3)
        bound = 1.0 / jnp.sqrt(jnp.float32(fin))
        w = jax.random.uniform(kw, (fin, fout), jnp.float32, -bound, bound)
        b = jax.random.uniform(kb, (1, fout), jnp.float32, -bound, bound)
        params.append((w, b))
    return params


def discriminator_ref(x, params):
    """Pure-JAX reference mirroring the kernel's bf16-input / f32-accum /
    bf16-epilogue math."""
    n_mm = len(params) - 1
    h = x.astype(jnp.bfloat16)
    for i in range(n_mm):
        w, b = params[i]
        acc = jnp.dot(h, w.astype(jnp.bfloat16),
                      preferred_element_type=jnp.float32) + b
        if i < n_mm - 1:
            a16 = acc.astype(jnp.bfloat16)
            h = jnp.maximum(a16, a16 * 0.2)
        else:
            h = jnp.maximum(acc, acc * 0.2)
    seq_info = h
    wf, bf = params[-1]
    final = (jnp.sum(seq_info * wf.reshape(1, -1), axis=-1, keepdims=True)
             + bf.reshape(1, 1))
    final = jnp.maximum(final, final * 0.2)
    return final, seq_info


# TODO(synk): calc_gradient_penalty (autograd-based training utility) is not part
# of the forward pass and is not translated to Pallas.

if __name__ == "__main__":
    key = jax.random.PRNGKey(0)
    batch = 8
    input_dim = 32
    info_dim = 16
    discriminator_dim = (64, 32)

    key, kx = jax.random.split(key)
    x = jax.random.normal(kx, (batch, input_dim), jnp.float32)
    params = init_discriminator_params(key, input_dim, info_dim, discriminator_dim)

    # weight padding / bf16 cast is hoisted out of the forward call.
    prepared = prepare_discriminator_params(params)

    final_out, seq_info = discriminator_forward(x, prepared)
    jax.block_until_ready((final_out, seq_info))

    ref_final, ref_info = discriminator_ref(x, params)
    assert final_out.shape == (batch, 1)
    assert seq_info.shape == (batch, info_dim)
    assert jnp.allclose(final_out, ref_final, atol=2e-3, rtol=2e-3)
    assert jnp.allclose(seq_info, ref_info, atol=2e-3, rtol=2e-3)

    print("KERNEL_OK")
</pallas_src>

<mosaic_0001>
module attributes {stable_mosaic.version = 11 : i64} {
  func.func @kernel(%arg0: i32, %arg1: memref<16x32xf32, #tpu.memory_space<vmem>>, %arg2: memref<32x128xbf16, #tpu.memory_space<vmem>>, %arg3: memref<1x128xf32, #tpu.memory_space<vmem>>, %arg4: memref<128x128xbf16, #tpu.memory_space<vmem>>, %arg5: memref<1x128xf32, #tpu.memory_space<vmem>>, %arg6: memref<128x128xbf16, #tpu.memory_space<vmem>>, %arg7: memref<1x128xf32, #tpu.memory_space<vmem>>, %arg8: memref<1x128xf32, #tpu.memory_space<vmem>>, %arg9: memref<1x1xf32, #tpu.memory_space<smem>>, %arg10: memref<16x128xf32, #tpu.memory_space<vmem>>) attributes {dimension_semantics = [#tpu.dimension_semantics<parallel>], iteration_bounds = array<i64: 1>, scalar_prefetch = 0 : i64, scratch_operands = 0 : i64, tpu.core_type = #tpu.core_type<tc>, window_params = [{transform_indices = @transform_0, window_bounds = array<i64: 16, 32>}, {pipeline_mode = #tpu.pipeline_mode<synchronous>, transform_indices = @transform_1, window_bounds = array<i64: 32, 128>}, {pipeline_mode = #tpu.pipeline_mode<synchronous>, transform_indices = @transform_2, window_bounds = array<i64: 1, 128>}, {pipeline_mode = #tpu.pipeline_mode<synchronous>, transform_indices = @transform_3, window_bounds = array<i64: 128, 128>}, {pipeline_mode = #tpu.pipeline_mode<synchronous>, transform_indices = @transform_4, window_bounds = array<i64: 1, 128>}, {pipeline_mode = #tpu.pipeline_mode<synchronous>, transform_indices = @transform_5, window_bounds = array<i64: 128, 128>}, {pipeline_mode = #tpu.pipeline_mode<synchronous>, transform_indices = @transform_6, window_bounds = array<i64: 1, 128>}, {pipeline_mode = #tpu.pipeline_mode<synchronous>, transform_indices = @transform_7, window_bounds = array<i64: 1, 128>}, {transform_indices = @transform_8, window_bounds = array<i64: 1, 1>}, {transform_indices = @transform_9, window_bounds = array<i64: 16, 128>}]} {
    %c0 = arith.constant 0 : index
    %c0_0 = arith.constant 0 : index
    %0 = vector.load %arg1[%c0, %c0_0] : memref<16x32xf32, #tpu.memory_space<vmem>>, vector<16x32xf32>
    %1 = arith.truncf %0 : vector<16x32xf32> to vector<16x32xbf16>
    %c0_1 = arith.constant 0 : index
    %c0_2 = arith.constant 0 : index
    %2 = vector.load %arg2[%c0_1, %c0_2] : memref<32x128xbf16, #tpu.memory_space<vmem>>, vector<32x128xbf16>
    %c0_3 = arith.constant 0 : index
    %c0_4 = arith.constant 0 : index
    %3 = vector.load %arg3[%c0_3, %c0_4] : memref<1x128xf32, #tpu.memory_space<vmem>>, vector<1x128xf32>
    %cst = arith.constant dense<0.000000e+00> : vector<16x128xf32>
    %4 = tpu.matmul %1, %2, %cst {dimension_numbers = #tpu.dot_dimension_numbers<[1], [0], [0], [1], [0, 0, 1, 1], [], []>} : vector<16x32xbf16>, vector<32x128xbf16>, vector<16x128xf32> -> vector<16x128xf32>
    %5 = vector.broadcast %3 : vector<1x128xf32> to vector<16x128xf32>
    %6 = arith.addf %4, %5 : vector<16x128xf32>
    %7 = arith.truncf %6 : vector<16x128xf32> to vector<16x128xbf16>
    %cst_5 = arith.constant 2.001950e-01 : bf16
    %8 = vector.broadcast %cst_5 : bf16 to vector<16x128xbf16>
    %9 = arith.mulf %7, %8 : vector<16x128xbf16>
    %10 = arith.maximumf %7, %9 : vector<16x128xbf16>
    %c0_6 = arith.constant 0 : index
    %c0_7 = arith.constant 0 : index
    %11 = vector.load %arg4[%c0_6, %c0_7] : memref<128x128xbf16, #tpu.memory_space<vmem>>, vector<128x128xbf16>
    %c0_8 = arith.constant 0 : index
    %c0_9 = arith.constant 0 : index
    %12 = vector.load %arg5[%c0_8, %c0_9] : memref<1x128xf32, #tpu.memory_space<vmem>>, vector<1x128xf32>
    %cst_10 = arith.constant dense<0.000000e+00> : vector<16x128xf32>
    %13 = tpu.matmul %10, %11, %cst_10 {dimension_numbers = #tpu.dot_dimension_numbers<[1], [0], [0], [1], [0, 0, 1, 1], [], []>} : vector<16x128xbf16>, vector<128x128xbf16>, vector<16x128xf32> -> vector<16x128xf32>
    %14 = vector.broadcast %12 : vector<1x128xf32> to vector<16x128xf32>
    %15 = arith.addf %13, %14 : vector<16x128xf32>
    %16 = arith.truncf %15 : vector<16x128xf32> to vector<16x128xbf16>
    %cst_11 = arith.constant 2.001950e-01 : bf16
    %17 = vector.broadcast %cst_11 : bf16 to vector<16x128xbf16>
    %18 = arith.mulf %16, %17 : vector<16x128xbf16>
    %19 = arith.maximumf %16, %18 : vector<16x128xbf16>
    %c0_12 = arith.constant 0 : index
    %c0_13 = arith.constant 0 : index
    %20 = vector.load %arg6[%c0_12, %c0_13] : memref<128x128xbf16, #tpu.memory_space<vmem>>, vector<128x128xbf16>
    %c0_14 = arith.constant 0 : index
    %c0_15 = arith.constant 0 : index
    %21 = vector.load %arg7[%c0_14, %c0_15] : memref<1x128xf32, #tpu.memory_space<vmem>>, vector<1x128xf32>
    %cst_16 = arith.constant dense<0.000000e+00> : vector<16x128xf32>
    %22 = tpu.matmul %19, %20, %cst_16 {dimension_numbers = #tpu.dot_dimension_numbers<[1], [0], [0], [1], [0, 0, 1, 1], [], []>} : vector<16x128xbf16>, vector<128x128xbf16>, vector<16x128xf32> -> vector<16x128xf32>
    %23 = vector.broadcast %21 : vector<1x128xf32> to vector<16x128xf32>
    %24 = arith.addf %22, %23 : vector<16x128xf32>
    %cst_17 = arith.constant 2.000000e-01 : f32
    %25 = vector.broadcast %cst_17 : f32 to vector<16x128xf32>
    %26 = arith.mulf %24, %25 : vector<16x128xf32>
    %27 = arith.maximumf %24, %26 : vector<16x128xf32>
    %c0_18 = arith.constant 0 : index
    %c0_19 = arith.constant 0 : index
    %28 = vector.load %arg10[%c0_18, %c0_19] : memref<16x128xf32, #tpu.memory_space<vmem>>, vector<16x128xf32>
    tpu.vector_store %arg10[%c0_18, %c0_19], %27 {strides = array<i32>} : memref<16x128xf32, #tpu.memory_space<vmem>>, vector<16x128xf32>,
    %c0_20 = arith.constant 0 : index
    %c0_21 = arith.constant 0 : index
    %29 = vector.load %arg8[%c0_20, %c0_21] : memref<1x128xf32, #tpu.memory_space<vmem>>, vector<1x128xf32>
    %c0_22 = arith.constant 0 : index
    %c0_23 = arith.constant 0 : index
    %30 = memref.load %arg9[%c0_22, %c0_23] : memref<1x1xf32, #tpu.memory_space<smem>>
    %31 = vector.broadcast %29 : vector<1x128xf32> to vector<16x128xf32>
    %32 = arith.mulf %27, %31 : vector<16x128xf32>
    %cst_24 = arith.constant dense<0.000000e+00> : vector<16xf32>
    %33 = vector.multi_reduction <add>, %32, %cst_24 [1] : vector<16x128xf32> to vector<16xf32>
    %34 = vector.shape_cast %33 : vector<16xf32> to vector<16x1xf32>
    %35 = vector.broadcast %30 : f32 to vector<16x1xf32>
    %36 = arith.addf %34, %35 : vector<16x1xf32>
    %cst_25 = arith.constant 2.000000e-01 : f32
    %37 = vector.broadcast %cst_25 : f32 to vector<16x1xf32>
    %38 = arith.mulf %36, %37 : vector<16x1xf32>
    %39 = arith.maximumf %36, %38 : vector<16x1xf32>
    %c0_26 = arith.constant 0 : index
    %c16 = arith.constant 16 : index
    %40 = vector.load %arg10[%c0_26, %c16] : memref<16x128xf32, #tpu.memory_space<vmem>>, vector<16x1xf32>
    tpu.vector_store %arg10[%c0_26, %c16], %39 {strides = array<i32>} : memref<16x128xf32, #tpu.memory_space<vmem>>, vector<16x1xf32>,
    return
  }
  func.func @transform_0(%arg0: i32) -> (i32, i32) {
    %c0_i32 = arith.constant 0 : i32
    %c0_i32_0 = arith.constant 0 : i32
    return %arg0, %c0_i32 : i32, i32
  }
  func.func @transform_1(%arg0: i32) -> (i32, i32) {
    %c0_i32 = arith.constant 0 : i32
    %c0_i32_0 = arith.constant 0 : i32
    %c0_i32_1 = arith.constant 0 : i32
    return %c0_i32, %c0_i32_0 : i32, i32
  }
  func.func @transform_2(%arg0: i32) -> (i32, i32) {
    %c0_i32 = arith.constant 0 : i32
    %c0_i32_0 = arith.constant 0 : i32
    %c0_i32_1 = arith.constant 0 : i32
    return %c0_i32, %c0_i32_0 : i32, i32
  }
  func.func @transform_3(%arg0: i32) -> (i32, i32) {
    %c0_i32 = arith.constant 0 : i32
    %c0_i32_0 = arith.constant 0 : i32
    %c0_i32_1 = arith.constant 0 : i32
    return %c0_i32, %c0_i32_0 : i32, i32
  }
  func.func @transform_4(%arg0: i32) -> (i32, i32) {
    %c0_i32 = arith.constant 0 : i32
    %c0_i32_0 = arith.constant 0 : i32
    %c0_i32_1 = arith.constant 0 : i32
    return %c0_i32, %c0_i32_0 : i32, i32
  }
  func.func @transform_5(%arg0: i32) -> (i32, i32) {
    %c0_i32 = arith.constant 0 : i32
    %c0_i32_0 = arith.constant 0 : i32
    %c0_i32_1 = arith.constant 0 : i32
    return %c0_i32, %c0_i32_0 : i32, i32
  }
  func.func @transform_6(%arg0: i32) -> (i32, i32) {
    %c0_i32 = arith.constant 0 : i32
    %c0_i32_0 = arith.constant 0 : i32
    %c0_i32_1 = arith.constant 0 : i32
    return %c0_i32, %c0_i32_0 : i32, i32
  }
  func.func @transform_7(%arg0: i32) -> (i32, i32) {
    %c0_i32 = arith.constant 0 : i32
    %c0_i32_0 = arith.constant 0 : i32
    %c0_i32_1 = arith.constant 0 : i32
    return %c0_i32, %c0_i32_0 : i32, i32
  }
  func.func @transform_8(%arg0: i32) -> (i32, i32) {
    %c0_i32 = arith.constant 0 : i32
    %c0_i32_0 = arith.constant 0 : i32
    %c0_i32_1 = arith.constant 0 : i32
    return %c0_i32, %c0_i32_0 : i32, i32
  }
  func.func @transform_9(%arg0: i32) -> (i32, i32) {
    %c0_i32 = arith.constant 0 : i32
    %c0_i32_0 = arith.constant 0 : i32
    return %arg0, %c0_i32 : i32, i32
  }
}

</mosaic_0001>

<bundles_post_ra>
// kernel: tpu_custom_call.1
= control target key start
LH: loop header
LB: loop body
LE: loop exit
PB: predicated region body
PF: predicated region fallthrough
CT: control target
= control target key end

     0   :  { %15 = vsyncpa [#allocation4], 0  ;;  %s704_s0 = inlined_call_operand.hbm [shape: f32[8,32], index: 0, kind: input, shape index: {}]   ;;  %s705_s1 = inlined_call_operand.hbm [shape: bf16[32,128], index: 1, kind: input, shape index: {}]   ;;  %s706_s2 = inlined_call_operand.vmem [shape: f32[1,128], index: 2, kind: input, shape index: {}]   ;;  %s707_s3 = inlined_call_operand.hbm [shape: bf16[128,128], index: 3, kind: input, shape index: {}]   ;;  %s708_s4 = inlined_call_operand.vmem [shape: f32[1,128], index: 4, kind: input, shape index: {}]   ;;  %s709_s5 = inlined_call_operand.hbm [shape: bf16[128,128], index: 5, kind: input, shape index: {}]   ;;  %s710_s6 = inlined_call_operand.vmem [shape: f32[1,128], index: 6, kind: input, shape index: {}]   ;;  %s711_s7 = inlined_call_operand.vmem [shape: f32[1,128], index: 7, kind: input, shape index: {}]   ;;  %s712_s8 = inlined_call_operand.<no memory space> [shape: f32[1,1], index: 8, kind: input, shape index: {}]   ;;  %s713_s9 = inlined_call_operand.hbm [shape: f32[8,128], index: 9, kind: output, shape index: {}]  }
   0x1   :  { %16 = vsyncpa [#allocation7], 0 }
   0x2   :  { %17 = vsyncpa [#allocation10], 0 }
   0x3   :  { %18 = vsyncpa [#allocation5], 0  ;;  %s36_s11 = sshll.u32 %s705_s1, 4  ;;  %s37_s11 = int_to_ptr.hbm [resolvable:$true] %s36_s11 }
   0x4   :  { %22 = vsyncadd [#allocation4], 128  ;;  %s609_s12 = smov [#allocation6]   ;;  %s23_s16 = sshll.u32 %s704_s0, 4  ;;  %s24_s16 = int_to_ptr.hbm [resolvable:$true] %s23_s16 }
   0x5   :  { %s38_s13 = sshll.u32 %s609_s12, 4  ;;  %s610_s17 = smov 64   ;;  %s39_s13 = int_to_ptr.vmem [resolvable:$true] %s38_s13 }
   0x6   :  { %s611_s18 = smov 4   ;;  %s612_s19 = smov [#allocation3]  }
   0x7   :  { %44 = dma.hbm_to_vmem [thread:$0]  %s37_s11, 256, %s39_s13, [#allocation7], %s610_s17, %s610_s17, %s611_s18  }
   0x8   :  { %s25_s20 = sshll.u32 %s612_s19, 4  ;;  %s613_s21 = smov 128   ;;  %s26_s20 = int_to_ptr.vmem [resolvable:$true] %s25_s20 }
   0x9   :  { %s614_s22 = smov 8   ;;  %s51_s24 = sshll.u32 %s707_s3, 4  ;;  %s52_s24 = int_to_ptr.hbm [resolvable:$true] %s51_s24 }
   0xa   :  { %31 = dma.hbm_to_vmem [thread:$0]  %s24_s16, 128, %s26_s20, [#allocation4], %s613_s21, %s613_s21, %s614_s22  }
   0xb   :  { %s615_s25 = smov [#allocation8]   ;;  %s66_s28 = sshll.u32 %s709_s5, 4  ;;  %s67_s28 = int_to_ptr.hbm [resolvable:$true] %s66_s28 }
   0xc   :  { %s53_s0 = sshll.u32 %s615_s25, 4  ;;  %s616_s29 = smov [#allocation9]   ;;  %s54_s0 = int_to_ptr.vmem [resolvable:$true] %s53_s0 }
   0xd   :  { %59 = dma.hbm_to_vmem [thread:$0]  %s52_s24, 1024, %s54_s0, [#allocation7], %s610_s17, %s610_s17, %s611_s18  }
   0xe   :  { %s68_s30 = sshll.u32 %s616_s29, 4  ;;  %s69_s30 = int_to_ptr.vmem [resolvable:$true] %s68_s30 }
   0xf   :  { %74 = dma.hbm_to_vmem [thread:$0]  %s67_s28, 1024, %s69_s30, [#allocation10], %s610_s17, %s610_s17, %s611_s18  }
  0x10   :  { %601 = dma.done.wait [#allocation4], 256  }
  0x11   :  { %602 = vsyncadd [#allocation4], 4294967040 }
  0x12   :  { %603 = dma.done.wait [#allocation7], 1280  }
  0x13   :  { %604 = vsyncadd [#allocation7], 4294966016 }
  0x14   :  { %605 = dma.done.wait [#allocation10], 1024  }
  0x15   :  { %606 = vsyncadd [#allocation10], 4294966272  ;;  %v451_v0 = vld [vmem:[#allocation6 + $0x8] sm:$0xff]  ;;  %v450_v1 = vld [vmem:[#allocation6] sm:$0xff]  ;;  %vm121_vm0 = vcmask 261120   ;;  %v346_v61 = vstv %s712_s8  ;;  %vm353_vm1 = vcmask 138368  }
  0x16   :  { %v98_v2 = vld [vmem:[#allocation3] sm:$0xff]  ;;  %v459_v3 = vld [vmem:[#allocation8 + $0x38] sm:$0xff]  ;;  %131 = vmatpush.bf16.msra.mxu0 %v451_v0  ;;  %v99_v4 = vld [vmem:[#allocation3 + $0x8] sm:$0xff] }
  0x17   :  { %v458_v5 = vld [vmem:[#allocation8 + $0x30] sm:$0xff]  ;;  %220 = vmatpush.bf16.msra.mxu1 %v459_v3  ;;  %v100_v6 = vpack.c.bf16 %v99_v4, %v98_v2  ;;  %v457_v7 = vld [vmem:[#allocation8 + $0x28] sm:$0xff]  ;;  %v456_v8 = vld [vmem:[#allocation8 + $0x20] sm:$0xff] }
  0x18   :  { %v455_v9 = vld [vmem:[#allocation8 + $0x18] sm:$0xff]  ;;  %v454_v10 = vld [vmem:[#allocation8 + $0x10] sm:$0xff]  ;;  %v453_v11 = vld [vmem:[#allocation8 + $0x8] sm:$0xff] }
  0x19   :  { %v452_v12 = vld [vmem:[#allocation8] sm:$0xff]  ;;  %v467_v13 = vld [vmem:[#allocation9 + $0x38] sm:$0xff]  ;;  %v466_v14 = vld [vmem:[#allocation9 + $0x30] sm:$0xff] }
  0x1a   :  { %132 = vmatpush.bf16.msra.mxu0 %v450_v1  ;;  %315 = vmatpush.bf16.msra.mxu2 %v467_v13  ;;  %v465_v15 = vld [vmem:[#allocation9 + $0x28] sm:$0xff]  ;;  %v477_v16 = vld [vmem:[%s706_s2] ss:$0 sm:$0xff]  ;;  %v463_v31 = vld [vmem:[#allocation9 + $0x18] sm:$0xff] }
  0x1b   :  { %221 = vmatpush.bf16.msra.mxu1 %v458_v5  ;;  %v464_v30 = vld [vmem:[#allocation9 + $0x20] sm:$0xff]  ;;  %v462_v32 = vld [vmem:[#allocation9 + $0x10] sm:$0xff]  ;;  %v461_v33 = vld [vmem:[#allocation9 + $0x8] sm:$0xff] }
  0x1c   :  { %v460_v34 = vld [vmem:[#allocation9] sm:$0xff] }
  0x1d   :  { %385 = vmatmul.msk.bf16.vlgmr.msra.gmra.mxu0 %vm121_vm0, %v100_v6  ;;  %v478_v35 = vld [vmem:[%s708_s4] ss:$0 sm:$0xff] }
  0x1e   :  { %316 = vmatpush.bf16.msra.mxu2 %v466_v14  ;;  %v479_v49 = vld [vmem:[%s710_s6] ss:$0 sm:$0xff] }
  0x1f   :  { %222 = vmatpush.bf16.msra.mxu1 %v457_v7  ;;  %v480_v53 = vld [vmem:[%s711_s7] ss:$0 sm:$0xff] }
  0x22   :  { %317 = vmatpush.bf16.msra.mxu2 %v465_v15 }
  0x23   :  { %223 = vmatpush.bf16.msra.mxu1 %v456_v8 }
  0x26   :  { %318 = vmatpush.bf16.msra.mxu2 %v464_v30 }
  0x27   :  { %224 = vmatpush.bf16.msra.mxu1 %v455_v9 }
  0x2a   :  { %319 = vmatpush.bf16.msra.mxu2 %v463_v31 }
  0x2b   :  { %225 = vmatpush.bf16.msra.mxu1 %v454_v10 }
  0x2e   :  { %320 = vmatpush.bf16.msra.mxu2 %v462_v32 }
  0x2f   :  { %226 = vmatpush.bf16.msra.mxu1 %v453_v11 }
  0x32   :  { %321 = vmatpush.bf16.msra.mxu2 %v461_v33 }
  0x33   :  { %227 = vmatpush.bf16.msra.mxu1 %v452_v12 }
  0x36   :  { %322 = vmatpush.bf16.msra.mxu2 %v460_v34 }
  0x9a   :  { %v134_v17 = vpop.f32.mrf.mxu0 }
  0x9b   :  { %v135_v18 = vadd.f32 %v477_v16, %v134_v17 }
  0x9d   :  { %v139_v19 = vpack.c.bf16 %v135_v18, %v135_v18 }
  0x9f   :  { %v141_v21 = vunpack.c.l.bf16 %v139_v19 }
  0xa1   :  { %v143_v24 = vmul.f32 0.20019531, %v141_v21 }
  0xa2   :  { %v136_v20 = vpop.f32.mrf.mxu0 }
  0xa3   :  { %v137_v22 = vadd.f32 %v477_v16, %v136_v20  ;;  %v149_v27 = vmax.f32 %v141_v21, %v143_v24 }
  0xa5   :  { %v140_v23 = vpack.c.bf16 %v137_v22, %v137_v22 }
  0xa7   :  { %v142_v25 = vunpack.c.l.bf16 %v140_v23 }
  0xa9   :  { %v144_v26 = vmul.f32 0.20019531, %v142_v25 }
  0xab   :  { %v150_v28 = vmax.f32 %v142_v25, %v144_v26 }
  0xad   :  { %v151_v29 = vpack.c.bf16 %v150_v28, %v149_v27 }
  0xaf   :  { %228 = vmatmul.bf16.vlgmr.msra.gmra.mxu1 %v151_v29 }
 0x12c   :  { %v229_v36 = vpop.f32.mrf.mxu1 }
 0x12d   :  { %v230_v37 = vadd.f32 %v478_v35, %v229_v36 }
 0x12f   :  { %v234_v38 = vpack.c.bf16 %v230_v37, %v230_v37 }
 0x131   :  { %v236_v40 = vunpack.c.l.bf16 %v234_v38 }
 0x133   :  { %v238_v43 = vmul.f32 0.20019531, %v236_v40 }
 0x134   :  { %v231_v39 = vpop.f32.mrf.mxu1 }
 0x135   :  { %v232_v41 = vadd.f32 %v478_v35, %v231_v39  ;;  %v244_v46 = vmax.f32 %v236_v40, %v238_v43 }
 0x137   :  { %v235_v42 = vpack.c.bf16 %v232_v41, %v232_v41 }
 0x139   :  { %v237_v44 = vunpack.c.l.bf16 %v235_v42 }
 0x13b   :  { %v239_v45 = vmul.f32 0.20019531, %v237_v44 }
 0x13d   :  { %v245_v47 = vmax.f32 %v237_v44, %v239_v45 }
 0x13f   :  { %v246_v48 = vpack.c.bf16 %v245_v47, %v244_v46 }
 0x141   :  { %323 = vmatmul.bf16.vlgmr.msra.gmra.mxu2 %v246_v48 }
 0x1c4   :  { %v324_v50 = vpop.f32.mrf.mxu2 }
 0x1c5   :  { %v325_v51 = vadd.f32 %v479_v49, %v324_v50 }
 0x1c7   :  { %v329_v52 = vmul.f32 0.2, %v325_v51 }
 0x1c9   :  { %v331_v54 = vmax.f32 %v325_v51, %v329_v52 }
 0x1cb   :  { %v340_v55 = vmul.f32 %v480_v53, %v331_v54  ;;  %333 = vst [vmem:[#allocation11] sm:$0xff] %v331_v54 }
 0x1cc   :  { %v326_v56 = vpop.f32.mrf.mxu2 }
 0x1cd   :  { %v327_v57 = vadd.f32 %v479_v49, %v326_v56  ;;  %342 = vadd.xlane.f32.xlu0 %v340_v55 }
 0x1cf   :  { %v330_v58 = vmul.f32 0.2, %v327_v57 }
 0x1d1   :  { %v332_v59 = vmax.f32 %v327_v57, %v330_v58 }
 0x1d3   :  { %334 = vst [vmem:[#allocation11 + $0x8] sm:$0xff] %v332_v59  ;;  %v341_v60 = vmul.f32 %v480_v53, %v332_v59 }
 0x1d5   :  { %344 = vadd.xlane.f32.xlu0 %v341_v60 }
 0x240   :  { %v343_v62 = vpop.xlane.xlu0 %342 }
 0x241   :  { %v347_v63 = vadd.f32 %v346_v61, %v343_v62 }
 0x243   :  { %v349_v0 = vmul.f32 0.2, %v347_v63 }
 0x245   :  { %v351_v1 = vmax.f32 %v347_v63, %v349_v0 }
 0x247   :  { %354 = vst.msk [vmem:[#allocation11] sm:$0xff] %vm353_vm1, %v351_v1 }
 0x248   :  { %v345_v2 = vpop.xlane.xlu0 %344 }
 0x249   :  { %v348_v3 = vadd.f32 %v346_v61, %v345_v2 }
 0x24b   :  { %v350_v4 = vmul.f32 0.2, %v348_v3 }
 0x24d   :  { %v352_v5 = vmax.f32 %v348_v3, %v350_v4 }
 0x24f   :  { %355 = vst.msk [vmem:[#allocation11 + $0x8] sm:$0xff] %vm353_vm1, %v352_v5 }
 0x250   :  { %359 = vsyncadd [#allocation5], 128  ;;  %s362_s16 = sshll.u32 %s713_s9, 4  ;;  %s617_s17 = smov [#allocation11]   ;;  %s363_s16 = int_to_ptr.hbm [resolvable:$true] %s362_s16 }
 0x251   :  { %s360_s18 = sshll.u32 %s617_s17, 4  ;;  %s361_s18 = int_to_ptr.vmem [resolvable:$true] %s360_s18 }
 0x252   :  { %368 = dma.vmem_to_hbm [thread:$0]  %s361_s18, 128, %s363_s16, [#allocation5], %s613_s21, %s613_s21, %s614_s22  }
 0x253   :  { %607 = dma.done.wait [#allocation5], 256  }
 0x254   :  { %608 = vsyncadd [#allocation5], 4294967040 }
 0x255   :  { %373 = vsyncpa [#allocation4], 1 }
 0x256   :  { %374 = vsyncpa [#allocation7], 1 }
 0x257   :  { %375 = vsyncpa [#allocation10], 1 }
 0x258   :  { %376 = vsyncpa [#allocation5], 1 }

</bundles_post_ra>
